<compile_context>
chip_gen: v6e
topology: v6e:2x2x1
jax: 0.10.0
libtpu: 0.0.40
codegen_flags: <defaults>
</compile_context>

<pallas_src>
import jax
import jax.numpy as jnp
from jax import lax
from jax.experimental import pallas as pl
from jax.experimental.pallas import tpu as pltpu

LANE_W = 1024          # lane-dense last dim (multiple of 128)
MAX_BLOCK_ROWS = 512   # (512, 1024) f32 block = 2 MiB per buffer


def _avg_kernel(x_ref, y_ref, o_ref):
    # 0.5 * (x + y) in the input dtype (matches the PyTorch reference).
    o_ref[...] = (x_ref[...] + y_ref[...]) * 0.5


def _avg_pallas(x, y):
    """Elementwise 0.5*(x+y) via a lane-dense tiled Pallas kernel."""
    orig_shape = x.shape
    n = x.size

    rows_needed = -(-n // LANE_W)                       # ceil(n / LANE_W)
    block_rows = min(((rows_needed + 7) // 8) * 8, MAX_BLOCK_ROWS)
    rows = ((rows_needed + block_rows - 1) // block_rows) * block_rows
    padded = rows * LANE_W

    xf = x.reshape(-1)
    yf = y.reshape(-1)
    if padded != n:
        xf = jnp.pad(xf, (0, padded - n))
        yf = jnp.pad(yf, (0, padded - n))
    x2 = xf.reshape(rows, LANE_W)
    y2 = yf.reshape(rows, LANE_W)

    out2 = pl.pallas_call(
        _avg_kernel,
        out_shape=jax.ShapeDtypeStruct((rows, LANE_W), x.dtype),
        grid=(rows // block_rows,),
        in_specs=[
            pl.BlockSpec((block_rows, LANE_W), lambda i: (i, 0)),
            pl.BlockSpec((block_rows, LANE_W), lambda i: (i, 0)),
        ],
        out_specs=pl.BlockSpec((block_rows, LANE_W), lambda i: (i, 0)),
        compiler_params=pltpu.CompilerParams(
            dimension_semantics=("parallel",)),
    )(x2, y2)

    return out2.reshape(-1)[:n].reshape(orig_shape)


def dropnet(x, y, p, *, training=False, key=None, _prob=None):
    """DropNet forward. Returns (out, prob)."""
    assert x.shape == y.shape and x.dtype == y.dtype
    if not (0.0 <= p <= 1.0):
        raise ValueError(
            "dropout probability has to be between 0 and 1, but got {}".format(p))

    if not training:
        # Eval: always the average; no RNG, no branch.
        return _avg_pallas(x, y), jnp.float32(0.0)

    if _prob is not None:
        prob = jnp.asarray(_prob, dtype=jnp.float32)
    else:
        assert key is not None
        prob = jax.random.uniform(key, (), dtype=jnp.float32)

    # Uniform-over-the-call branch, hoisted out of the per-element path.
    # take-x / take-y never read the unused input or launch the kernel.
    idx = jnp.where(prob < 0.5 * p, 0,
                    jnp.where(prob > 1.0 - 0.5 * p, 1, 2)).astype(jnp.int32)
    out = lax.switch(
        idx,
        (lambda ops: ops[0],              # return x
         lambda ops: ops[1],              # return y
         lambda ops: _avg_pallas(*ops)),  # 0.5*(x+y) kernel
        (x, y),
    )
    return out, prob


def dropnet_ref(x, y, p, *, training, prob):
    if training:
        if prob < p / 2:
            return x
        if prob > 1 - p / 2:
            return y
        return 0.5 * (x + y)
    return 0.5 * (x + y)


if __name__ == "__main__":
    key = jax.random.PRNGKey(0)
    kx, ky, kdrop = jax.random.split(key, 3)

    # NCHW input shapes, consistent with a conv-style module.
    x = jax.random.normal(kx, (2, 4, 16, 16), dtype=jnp.float32)
    y = jax.random.normal(ky, (2, 4, 16, 16), dtype=jnp.float32)
    p = 0.3  # module hyperparameter (the only "parameter" in __init__)

    # Eval mode: always the average.
    out_eval, _ = dropnet(x, y, p, training=False)
    out_eval = jax.block_until_ready(out_eval)
    ref_eval = dropnet_ref(x, y, p, training=False, prob=None)
    assert jnp.allclose(out_eval, ref_eval, atol=1e-6, rtol=1e-6)

    # Training mode: branch selected by a sampled uniform scalar.
    out_train, prob = dropnet(x, y, p, training=True, key=kdrop)
    out_train = jax.block_until_ready(out_train)
    ref_train = dropnet_ref(x, y, p, training=True, prob=float(prob))
    assert jnp.allclose(out_train, ref_train, atol=1e-6, rtol=1e-6)

    # Force the x-branch and y-branch explicitly (hoisted-branch path).
    out_x, _ = dropnet(x, y, p, training=True, _prob=0.01)   # 0.01 < 0.15 -> x
    out_x = jax.block_until_ready(out_x)
    assert jnp.allclose(out_x, x, atol=1e-6, rtol=1e-6)

    out_y, _ = dropnet(x, y, p, training=True, _prob=0.99)   # 0.99 > 0.85 -> y
    out_y = jax.block_until_ready(out_y)
    assert jnp.allclose(out_y, y, atol=1e-6, rtol=1e-6)

    # Non-tile-aligned shape exercises the padding path.
    xb = jax.random.normal(kx, (2, 3, 5, 7), dtype=jnp.float32)
    yb = jax.random.normal(ky, (2, 3, 5, 7), dtype=jnp.float32)
    out_b, _ = dropnet(xb, yb, p, training=False)
    out_b = jax.block_until_ready(out_b)
    assert jnp.allclose(out_b, 0.5 * (xb + yb), atol=1e-6, rtol=1e-6)

    print("KERNEL_OK")
</pallas_src>

<mosaic_0001>
module attributes {stable_mosaic.version = 11 : i64} {
  func.func @_avg_kernel(%arg0: i32, %arg1: memref<8x1024xf32, #tpu.memory_space<vmem>>, %arg2: memref<8x1024xf32, #tpu.memory_space<vmem>>, %arg3: memref<8x1024xf32, #tpu.memory_space<vmem>>) attributes {dimension_semantics = [#tpu.dimension_semantics<parallel>], iteration_bounds = array<i64: 1>, scalar_prefetch = 0 : i64, scratch_operands = 0 : i64, tpu.core_type = #tpu.core_type<tc>, window_params = [{transform_indices = @transform_0, window_bounds = array<i64: 8, 1024>}, {transform_indices = @transform_1, window_bounds = array<i64: 8, 1024>}, {transform_indices = @transform_2, window_bounds = array<i64: 8, 1024>}]} {
    %c0 = arith.constant 0 : index
    %c0_0 = arith.constant 0 : index
    %0 = vector.load %arg1[%c0, %c0_0] : memref<8x1024xf32, #tpu.memory_space<vmem>>, vector<8x1024xf32>
    %c0_1 = arith.constant 0 : index
    %c0_2 = arith.constant 0 : index
    %1 = vector.load %arg2[%c0_1, %c0_2] : memref<8x1024xf32, #tpu.memory_space<vmem>>, vector<8x1024xf32>
    %2 = arith.addf %0, %1 : vector<8x1024xf32>
    %cst = arith.constant 5.000000e-01 : f32
    %3 = vector.broadcast %cst : f32 to vector<8x1024xf32>
    %4 = arith.mulf %2, %3 : vector<8x1024xf32>
    %c0_3 = arith.constant 0 : index
    %c0_4 = arith.constant 0 : index
    %5 = vector.load %arg3[%c0_3, %c0_4] : memref<8x1024xf32, #tpu.memory_space<vmem>>, vector<8x1024xf32>
    tpu.vector_store %arg3[%c0_3, %c0_4], %4 {strides = array<i32>} : memref<8x1024xf32, #tpu.memory_space<vmem>>, vector<8x1024xf32>,
    return
  }
  func.func @transform_0(%arg0: i32) -> (i32, i32) {
    %c0_i32 = arith.constant 0 : i32
    %c0_i32_0 = arith.constant 0 : i32
    return %arg0, %c0_i32 : i32, i32
  }
  func.func @transform_1(%arg0: i32) -> (i32, i32) {
    %c0_i32 = arith.constant 0 : i32
    %c0_i32_0 = arith.constant 0 : i32
    return %arg0, %c0_i32 : i32, i32
  }
  func.func @transform_2(%arg0: i32) -> (i32, i32) {
    %c0_i32 = arith.constant 0 : i32
    %c0_i32_0 = arith.constant 0 : i32
    return %arg0, %c0_i32 : i32, i32
  }
}

</mosaic_0001>

<bundles_post_ra>
// kernel: tpu_custom_call.1
= control target key start
LH: loop header
LB: loop body
LE: loop exit
PB: predicated region body
PF: predicated region fallthrough
CT: control target
= control target key end

     0   :  { %7 = vsyncpa [#allocation3], 0  ;;  %s188_s0 = inlined_call_operand.hbm [shape: f32[8,1024], index: 0, kind: input, shape index: {}]   ;;  %s189_s1 = inlined_call_operand.hbm [shape: f32[8,1024], index: 1, kind: input, shape index: {}]   ;;  %s190_s2 = inlined_call_operand.hbm [shape: f32[8,1024], index: 2, kind: output, shape index: {}]  }
   0x1   :  { %8 = vsyncpa [#allocation6], 0 }
   0x2   :  { %9 = vsyncpa [#allocation4], 0  ;;  %s161_s9 = smov [#allocation2]   ;;  %s162_s11 = smov [#allocation5]  }
   0x3   :  { %s16_s10 = sshll.u32 %s161_s9, 4  ;;  %s26_s12 = sshll.u32 %s162_s11, 4  ;;  %s17_s10 = int_to_ptr.vmem [resolvable:$true] %s16_s10  ;;  %s27_s12 = int_to_ptr.vmem [resolvable:$true] %s26_s12 }
   0x4   :  { %s103_s13 = scalar_lea.vmem %s17_s10, 1024  ;;  %p108_p1 = scmp.lt.s32.totalorder %s17_s10, %s17_s10 }
   0x5   :  { %p104_p0 = scmp.ne.s32.totalorder %s17_s10, %s103_s13  ;;  %p109_p2 = scmp.lt.s32.totalorder %s103_s13, %s103_s13 }
   0x7   :  { %p110_p3 = por %p109_p2, %p108_p1 }
   0x9   :  { %p111_p4 = pnand %p110_p3, %p104_p0 }
   0xb   :  { %114 = shalt.err (!%p111_p4)
}
   0xc   :  { %19 = dma.hbm_to_vmem [thread:$0]  %s188_s0, 1024, %s17_s10, [#allocation3]  }
   0xd   :  { %s123_s16 = scalar_lea.vmem %s27_s12, 1024  ;;  %p128_p6 = scmp.lt.s32.totalorder %s27_s12, %s27_s12 }
   0xe   :  { %p124_p5 = scmp.ne.s32.totalorder %s27_s12, %s123_s16  ;;  %p129_p7 = scmp.lt.s32.totalorder %s123_s16, %s123_s16 }
  0x10   :  { %p130_p8 = por %p129_p7, %p128_p6 }
  0x12   :  { %p131_p9 = pnand %p130_p8, %p124_p5 }
  0x14   :  { %134 = shalt.err (!%p131_p9)
}
  0x15   :  { %29 = dma.hbm_to_vmem [thread:$0]  %s189_s1, 1024, %s27_s12, [#allocation6]  }
  0x16   :  { %155 = dma.done.wait [#allocation3], 1024  }
  0x17   :  { %156 = vsyncadd [#allocation3], 4294966272 }
  0x18   :  { %157 = dma.done.wait [#allocation6], 1024  }
  0x19   :  { %158 = vsyncadd [#allocation6], 4294966272  ;;  %v36_v0 = vld [vmem:[#allocation2] sm:$0xff]  ;;  %v37_v2 = vld [vmem:[#allocation2 + $0x8] sm:$0xff]  ;;  %s163_s0 = smov [#allocation7]  }
  0x1a   :  { %v44_v1 = vld [vmem:[#allocation5] sm:$0xff]  ;;  %v45_v4 = vld [vmem:[#allocation5 + $0x8] sm:$0xff]  ;;  %v38_v5 = vld [vmem:[#allocation2 + $0x10] sm:$0xff]  ;;  %s82_s1 = sshll.u32 %s163_s0, 4  ;;  %s83_s1 = int_to_ptr.vmem [resolvable:$true] %s82_s1 }
  0x1b   :  { %v52_v3 = vadd.f32 %v44_v1, %v36_v0  ;;  %v46_v6 = vld [vmem:[#allocation5 + $0x10] sm:$0xff]  ;;  %v53_v7 = vadd.f32 %v45_v4, %v37_v2  ;;  %v39_v9 = vld [vmem:[#allocation2 + $0x18] sm:$0xff]  ;;  %v40_v11 = vld [vmem:[#allocation2 + $0x20] sm:$0xff]  ;;  %s135_s19 = scalar_lea.vmem %s83_s1, 1024  ;;  %p140_p11 = scmp.lt.s32.totalorder %s83_s1, %s83_s1 }
  0x1c   :  { %v54_v8 = vadd.f32 %v46_v6, %v38_v5  ;;  %v47_v10 = vld [vmem:[#allocation5 + $0x18] sm:$0xff]  ;;  %v48_v14 = vld [vmem:[#allocation5 + $0x20] sm:$0xff]  ;;  %v41_v15 = vld [vmem:[#allocation2 + $0x28] sm:$0xff]  ;;  %p136_p10 = scmp.ne.s32.totalorder %s83_s1, %s135_s19  ;;  %p141_p12 = scmp.lt.s32.totalorder %s135_s19, %s135_s19 }
  0x1d   :  { %v60_v12 = vmul.f32 0.5, %v52_v3  ;;  %v55_v13 = vadd.f32 %v47_v10, %v39_v9  ;;  %v49_v16 = vld [vmem:[#allocation5 + $0x28] sm:$0xff]  ;;  %v61_v17 = vmul.f32 0.5, %v53_v7  ;;  %v56_v19 = vadd.f32 %v48_v14, %v40_v11  ;;  %v42_v21 = vld [vmem:[#allocation2 + $0x30] sm:$0xff]  ;;  %v43_v23 = vld [vmem:[#allocation2 + $0x38] sm:$0xff] }
  0x1e   :  { %v62_v18 = vmul.f32 0.5, %v54_v8  ;;  %v57_v20 = vadd.f32 %v49_v16, %v41_v15  ;;  %v50_v22 = vld [vmem:[#allocation5 + $0x30] sm:$0xff]  ;;  %v51_v26 = vld [vmem:[#allocation5 + $0x38] sm:$0xff]  ;;  %p142_p13 = por %p141_p12, %p140_p11 }
  0x1f   :  { %68 = vst [vmem:[#allocation7] sm:$0xff] %v60_v12  ;;  %v63_v24 = vmul.f32 0.5, %v55_v13  ;;  %v58_v25 = vadd.f32 %v50_v22, %v42_v21  ;;  %69 = vst [vmem:[#allocation7 + $0x8] sm:$0xff] %v61_v17  ;;  %v64_v27 = vmul.f32 0.5, %v56_v19  ;;  %v59_v29 = vadd.f32 %v51_v26, %v43_v23 }
  0x20   :  { %70 = vst [vmem:[#allocation7 + $0x10] sm:$0xff] %v62_v18  ;;  %v65_v28 = vmul.f32 0.5, %v57_v20  ;;  %p143_p0 = pnand %p142_p13, %p136_p10 }
  0x21   :  { %71 = vst [vmem:[#allocation7 + $0x18] sm:$0xff] %v63_v24  ;;  %v66_v30 = vmul.f32 0.5, %v58_v25  ;;  %72 = vst [vmem:[#allocation7 + $0x20] sm:$0xff] %v64_v27  ;;  %v67_v31 = vmul.f32 0.5, %v59_v29 }
  0x22   :  { %73 = vst [vmem:[#allocation7 + $0x28] sm:$0xff] %v65_v28 }
  0x23   :  { %74 = vst [vmem:[#allocation7 + $0x30] sm:$0xff] %v66_v30  ;;  %75 = vst [vmem:[#allocation7 + $0x38] sm:$0xff] %v67_v31 }
  0x24   :  { %146 = shalt.err (!%p143_p0)
}
  0x25   :  { %85 = dma.vmem_to_hbm [thread:$0]  %s83_s1, 1024, %s190_s2, [#allocation4]  }
  0x26   :  { %159 = dma.done.wait [#allocation4], 1024  }
  0x27   :  { %160 = vsyncadd [#allocation4], 4294966272 }
  0x28   :  { %89 = vsyncpa [#allocation3], 1 }
  0x29   :  { %90 = vsyncpa [#allocation6], 1 }
  0x2a   :  { %91 = vsyncpa [#allocation4], 1 }

</bundles_post_ra>
